<compile_context>
chip_gen: v7x
topology: tpu7x:2x2x1
jax: 0.10.0
libtpu: 0.0.40
codegen_flags: <defaults>
</compile_context>

<pallas_src>
import functools

import jax
import jax.numpy as jnp
from jax.experimental import pallas as pl
from jax.experimental.pallas import tpu as pltpu


# ---------------------------------------------------------------------------
# Tiled matmul kernel with fused (optional) bias + (optional) ReLU epilogue.
# ---------------------------------------------------------------------------
def _matmul_kernel(x_ref, w_ref, *refs, apply_relu, has_bias):
    # x_ref: (tm, tk)  w_ref: (tk, tn)  [b_ref: (1, tn)]  o_ref: (tm, tn)
    if has_bias:
        b_ref, o_ref, acc_ref = refs
    else:
        o_ref, acc_ref = refs
        b_ref = None

    k = pl.program_id(2)

    @pl.when(k == 0)
    def _():
        acc_ref[...] = jnp.zeros_like(acc_ref)

    acc_ref[...] += jnp.dot(
        x_ref[...], w_ref[...], preferred_element_type=jnp.float32
    )

    @pl.when(k == pl.num_programs(2) - 1)
    def _():
        acc = acc_ref[...]
        if has_bias:
            acc = acc + b_ref[...].astype(jnp.float32)  # (tm,tn) + (1,tn)
        if apply_relu:
            acc = jnp.maximum(acc, 0.0)
        o_ref[...] = acc.astype(o_ref.dtype)


def matmul_bias_act(x, w, b=None, *, apply_relu=False, tm=64, tn=128, tk=256,
                    out_dtype=None):
    """out = act(x @ w [+ b]); x:(M,K), w:(K,N), b:(N,) or None."""
    M, K = x.shape
    K2, N = w.shape
    assert K == K2, (K, K2)
    out_dtype = out_dtype if out_dtype is not None else x.dtype
    has_bias = b is not None

    # Fall back to full-extent blocks if the tile does not divide the dim
    # (demo shapes are chosen so lane-dense 128-wide tiles always divide).
    tm = tm if M % tm == 0 else M
    tn = tn if N % tn == 0 else N
    tk = tk if K % tk == 0 else (128 if K % 128 == 0 else K)

    grid = (M // tm, N // tn, K // tk)
    itemsize = jnp.dtype(x.dtype).itemsize

    in_specs = [
        pl.BlockSpec((tm, tk), lambda i, j, k: (i, k)),   # lhs
        pl.BlockSpec((tk, tn), lambda i, j, k: (k, j)),   # rhs
    ]
    operands = [x, w]
    bytes_accessed = (M * K + K * N + M * N) * itemsize
    if has_bias:
        in_specs.append(pl.BlockSpec((1, tn), lambda i, j, k: (0, j)))  # bias row
        operands.append(b.reshape(1, N).astype(jnp.float32))
        bytes_accessed += N * 4

    kernel = functools.partial(
        _matmul_kernel, apply_relu=apply_relu, has_bias=has_bias
    )
    return pl.pallas_call(
        kernel,
        out_shape=jax.ShapeDtypeStruct((M, N), out_dtype),
        grid_spec=pltpu.PrefetchScalarGridSpec(
            num_scalar_prefetch=0,
            grid=grid,
            in_specs=in_specs,
            out_specs=pl.BlockSpec((tm, tn), lambda i, j, k: (i, j)),
            scratch_shapes=[pltpu.VMEM((tm, tn), jnp.float32)],
        ),
        compiler_params=pltpu.CompilerParams(
            dimension_semantics=("parallel", "parallel", "arbitrary"),
            vmem_limit_bytes=32 * 1024 * 1024,
        ),
        cost_estimate=pl.CostEstimate(
            flops=2 * M * N * K,
            transcendentals=0,
            bytes_accessed=bytes_accessed,
        ),
    )(*operands)


# ---------------------------------------------------------------------------
# GNN forward: two cached-GCN conv layers with ReLU (+ eval-mode dropout).
# ---------------------------------------------------------------------------
def gcn_layer(a_hat, x, w, b, *, apply_relu):
    # CachedGCNConv: aggregate(A_hat, x @ W) + bias; ReLU fused into the
    # aggregation matmul's epilogue.
    z = matmul_bias_act(x, w, None, apply_relu=False)          # X @ W (no bias)
    return matmul_bias_act(a_hat, z, b, apply_relu=apply_relu)  # A_hat @ Z + b


def gnn_forward(x, a_hat, params):
    (w1, b1), (w2, b2) = params
    h = gcn_layer(a_hat, x, w1, b1, apply_relu=True)
    # TODO(synk): nn.Dropout(0.1) between layers is identity at inference; a
    # training-mode kernel would draw the mask with pltpu.prng_seed/prng_random_bits.
    return gcn_layer(a_hat, h, w2, b2, apply_relu=False)


def build_normalized_adjacency(edge_index, num_nodes, dtype=jnp.float32):
    """The per-`cache_name` cache of CachedGCNConv: D^-1/2 (A + I) D^-1/2."""
    src, dst = edge_index
    a = jnp.zeros((num_nodes, num_nodes), dtype)
    a = a.at[src, dst].set(1.0)
    a = a.at[dst, src].set(1.0)  # symmetrize
    a = jnp.minimum(a + jnp.eye(num_nodes, dtype=dtype), 1.0)  # self loops, dedup
    deg = jnp.sum(a, axis=1)
    d_inv_sqrt = jax.lax.rsqrt(deg)  # deg >= 1 thanks to self loops
    return a * d_inv_sqrt[:, None] * d_inv_sqrt[None, :]
    # TODO(synk): type='ppmi' (PPMIConv) only changes how this dense propagation
    # matrix is built (random-walk PPMI weights); the Pallas kernels are identical.


def gnn_reference(x, a_hat, params):
    (w1, b1), (w2, b2) = params
    h = jnp.maximum(a_hat @ (x @ w1) + b1, 0.0)
    return a_hat @ (h @ w2) + b2


if __name__ == "__main__":
    key = jax.random.PRNGKey(0)

    num_nodes = 128       # N: multiple of 8 (sublane) and of the 64-row tile
    num_features = 256    # dataset.num_features
    hidden = 128          # first conv width (hard-coded 128 in the module)
    encoder_dim = 128     # args.encoder_dim -> lane-dense output
    num_edges = 512

    k_x, k_e, k_w1, k_b1, k_w2, k_b2 = jax.random.split(key, 6)
    x = jax.random.normal(k_x, (num_nodes, num_features), jnp.float32)
    edge_index = jax.random.randint(k_e, (2, num_edges), 0, num_nodes)

    def glorot(k, shape):
        lim = (6.0 / (shape[0] + shape[1])) ** 0.5
        return jax.random.uniform(k, shape, jnp.float32, -lim, lim)

    w1 = glorot(k_w1, (num_features, hidden))
    b1 = jax.random.uniform(k_b1, (hidden,), jnp.float32, -0.1, 0.1)
    w2 = glorot(k_w2, (hidden, encoder_dim))
    b2 = jax.random.uniform(k_b2, (encoder_dim,), jnp.float32, -0.1, 0.1)
    params = ((w1, b1), (w2, b2))

    a_hat = build_normalized_adjacency(edge_index, num_nodes)

    out = gnn_forward(x, a_hat, params)
    out = jax.block_until_ready(out)

    ref = gnn_reference(x, a_hat, params)
    assert out.shape == (num_nodes, encoder_dim)
    # Loose-ish tolerance: MXU default f32 matmul precision differs slightly
    # from the XLA reference's accumulation order.
    assert jnp.allclose(out, ref, atol=2e-2, rtol=2e-2), "mismatch vs reference"

    print("KERNEL_OK")
</pallas_src>

<mosaic_0001>
module attributes {stable_mosaic.version = 11 : i64} {
  func.func @_matmul_kernel(%arg0: i32, %arg1: i32, %arg2: i32, %arg3: memref<64x256xf32, #tpu.memory_space<vmem>>, %arg4: memref<256x128xf32, #tpu.memory_space<vmem>>, %arg5: memref<64x128xf32, #tpu.memory_space<vmem>>, %arg6: memref<64x128xf32, #tpu.memory_space<vmem>>) attributes {dimension_semantics = [#tpu.dimension_semantics<parallel>, #tpu.dimension_semantics<parallel>, #tpu.dimension_semantics<arbitrary>], iteration_bounds = array<i64: 2, 1, 1>, scalar_prefetch = 0 : i64, scratch_operands = 1 : i64, tpu.core_type = #tpu.core_type<tc>, window_params = [{transform_indices = @transform_0, window_bounds = array<i64: 64, 256>}, {transform_indices = @transform_1, window_bounds = array<i64: 256, 128>}, {transform_indices = @transform_2, window_bounds = array<i64: 64, 128>}]} {
    %c0_i32 = arith.constant 0 : i32
    %0 = arith.cmpi eq, %arg2, %c0_i32 : i32
    %1 = arith.extui %0 : i1 to i32
    %c0_i32_0 = arith.constant 0 : i32
    %2 = arith.cmpi ne, %1, %c0_i32_0 : i32
    scf.if %2 {
      %cst_10 = arith.constant 0.000000e+00 : f32
      %12 = vector.broadcast %cst_10 : f32 to vector<64x128xf32>
      %c0_11 = arith.constant 0 : index
      %c0_12 = arith.constant 0 : index
      %13 = vector.load %arg6[%c0_11, %c0_12] : memref<64x128xf32, #tpu.memory_space<vmem>>, vector<64x128xf32>
      tpu.vector_store %arg6[%c0_11, %c0_12], %12 {strides = array<i32>} : memref<64x128xf32, #tpu.memory_space<vmem>>, vector<64x128xf32>,
    } else {
    }
    %c0 = arith.constant 0 : index
    %c0_1 = arith.constant 0 : index
    %3 = vector.load %arg6[%c0, %c0_1] : memref<64x128xf32, #tpu.memory_space<vmem>>, vector<64x128xf32>
    %c0_2 = arith.constant 0 : index
    %c0_3 = arith.constant 0 : index
    %4 = vector.load %arg3[%c0_2, %c0_3] : memref<64x256xf32, #tpu.memory_space<vmem>>, vector<64x256xf32>
    %c0_4 = arith.constant 0 : index
    %c0_5 = arith.constant 0 : index
    %5 = vector.load %arg4[%c0_4, %c0_5] : memref<256x128xf32, #tpu.memory_space<vmem>>, vector<256x128xf32>
    %cst = arith.constant dense<0.000000e+00> : vector<64x128xf32>
    %6 = tpu.matmul %4, %5, %cst {dimension_numbers = #tpu.dot_dimension_numbers<[1], [0], [0], [1], [0, 0, 1, 1], [], []>} : vector<64x256xf32>, vector<256x128xf32>, vector<64x128xf32> -> vector<64x128xf32>
    %7 = arith.addf %3, %6 : vector<64x128xf32>
    %c0_6 = arith.constant 0 : index
    %c0_7 = arith.constant 0 : index
    %8 = vector.load %arg6[%c0_6, %c0_7] : memref<64x128xf32, #tpu.memory_space<vmem>>, vector<64x128xf32>
    tpu.vector_store %arg6[%c0_6, %c0_7], %7 {strides = array<i32>} : memref<64x128xf32, #tpu.memory_space<vmem>>, vector<64x128xf32>,
    %c0_i32_8 = arith.constant 0 : i32
    %9 = arith.cmpi eq, %arg2, %c0_i32_8 : i32
    %10 = arith.extui %9 : i1 to i32
    %c0_i32_9 = arith.constant 0 : i32
    %11 = arith.cmpi ne, %10, %c0_i32_9 : i32
    scf.if %11 {
      %c0_10 = arith.constant 0 : index
      %c0_11 = arith.constant 0 : index
      %12 = vector.load %arg6[%c0_10, %c0_11] : memref<64x128xf32, #tpu.memory_space<vmem>>, vector<64x128xf32>
      %c0_12 = arith.constant 0 : index
      %c0_13 = arith.constant 0 : index
      %13 = vector.load %arg5[%c0_12, %c0_13] : memref<64x128xf32, #tpu.memory_space<vmem>>, vector<64x128xf32>
      tpu.vector_store %arg5[%c0_12, %c0_13], %12 {strides = array<i32>} : memref<64x128xf32, #tpu.memory_space<vmem>>, vector<64x128xf32>,
    } else {
    }
    return
  }
  func.func @transform_0(%arg0: i32, %arg1: i32, %arg2: i32) -> (i32, i32) {
    %c0_i32 = arith.constant 0 : i32
    return %arg0, %arg2 : i32, i32
  }
  func.func @transform_1(%arg0: i32, %arg1: i32, %arg2: i32) -> (i32, i32) {
    %c0_i32 = arith.constant 0 : i32
    return %arg2, %arg1 : i32, i32
  }
  func.func @transform_2(%arg0: i32, %arg1: i32, %arg2: i32) -> (i32, i32) {
    %c0_i32 = arith.constant 0 : i32
    return %arg0, %arg1 : i32, i32
  }
}

</mosaic_0001>

<bundles_post_ra>
// kernel: tpu_custom_call.1
= control target key start
LH: loop header
LB: loop body
LE: loop exit
PB: predicated region body
PF: predicated region fallthrough
CT: control target
= control target key end

     0   :  { %7 = vsyncpa [#allocation4], 0  ;;  %s1156_s0 = inlined_call_operand.hbm [shape: f32[128,256], index: 0, kind: input, shape index: {}]   ;;  %s1157_s1 = inlined_call_operand.hbm [shape: f32[256,128], index: 1, kind: input, shape index: {}]   ;;  %s1158_s2 = inlined_call_operand.hbm [shape: f32[128,128], index: 2, kind: output, shape index: {}]  }
   0x1   :  { %9 = vsyncpa [#allocation4 + $0x1], 0 }
   0x2   :  { %10 = vsyncpa [#allocation7], 0 }
   0x3   :  { %11 = vsyncpa [#allocation5], 0 }
   0x4   :  { %13 = vsyncpa [#allocation5 + $0x1], 0  ;;  %s918_s9 = smov 0   ;;  %s920_s10 = smov 0  }
   0x5   :  { %s922_s11 = smov 0   ;;  %s924_s12 = smov 0  }
   0x6   :  { %s926_s13 = smov 0   ;;  %s928_s14 = smov 0  }
   0x7 LB: > { %s544_s15 = sadd.s32 4294967295, %s892_s14   ;;  %s545_s16 = sadd.s32 4294967294, %s892_s14   ;;  %s892_s14 = sphi %s928_s14, %s19_s14   ;;  %s888_s13 = sphi %s926_s13, %s1182_s13   ;;  %s884_s12 = sphi %s924_s12, %s1181_s12   ;;  %s880_s11 = sphi %s922_s11, %s1180_s11   ;;  %s876_s10 = sphi %s920_s10, %s1179_s10   ;;  %s872_s9 = sphi %s918_s9, %s1178_s9  }
   0x8   : > { %p60_p0 = scmp.ne.s32.totalorder %s876_s10, %s872_s9  ;;  %p952_p1 = scmp.eq.s32.totalorder %s544_s15, 0 }
   0x9   : > { %p956_p2 = scmp.eq.s32.totalorder %s544_s15, 1  ;;  %p120_p3 = scmp.eq.s32.totalorder %s545_s16, 1 }
   0xa   : > { %s1163_s17 = scalar_select %p952_p1, 1, 0 }
   0xb   : > { %s1164_s18 = scalar_select %p956_p2, 1, 0 }
   0xc   : > { %p962_p4 = por %p952_p1, %p60_p0  ;;  %p546_p5 = scmp.ge.s32.totalorder %s892_s14, 1 }
   0xd   : > { %p967_p6 = por %p120_p3, %p60_p0  ;;  %p127_p7 = scmp.lt.s32.totalorder %s892_s14, 3 }
   0xe   : > { %s1165_s19 = scalar_select %p962_p4, 1, 0 }
   0xf   : > { %s1166_s20 = scalar_select %p967_p6, 1, 0 }
  0x10   : > { %p972_p8 = pnand %p546_p5, %p127_p7  ;;  %s894_s22 = smov [#allocation6]  }
  0x11   : > { %s143_s23 = sshll.u32 %s894_s22, 4  ;;  %s38_s25 = sadd.s32 1, %s888_s13  ;;  %s144_s23 = int_to_ptr.vmem [resolvable:$true] %s143_s23 }
  0x12   : > { %s1167_s21 = scalar_select %p972_p8, 1, 0 }
  0x13   : > { %p677_p9 = pneg %p972_p8  ;;  %s748_s28 = scalar_lea.hbm %s1157_s1, 4096 }
  0x14   : > { %p749_p12 = scmp.ne.s32.totalorder %s1157_s1, %s748_s28  ;;  %p755_p5 = scmp.lt.u32.totalorder %s748_s28, %s1157_s1 }
  0x15   : > { %p981_p11 = pnand %p677_p9, %p952_p1 }
  0x17   : > { %p750_p13 = pneg %p981_p11 }
  0x19   : > { %p751_p0 = pnand %p750_p13, %p749_p12 }
  0x1b   : > { %p752_p3 = pneg %p751_p0 }
  0x1d   : > { %p757_p7 = pnand %p755_p5, %p752_p3 }
  0x1f   : > { %760 = shalt.err (!%p757_p7)
}
  0x20   : > { %s761_s5 = scalar_lea.vmem %s144_s23, 4096  ;;  %p769_p1 = scmp.lt.s32.totalorder %s144_s23, %s144_s23 }
  0x21   : > { %p762_p9 = scmp.ne.s32.totalorder %s144_s23, %s761_s5  ;;  %p770_p4 = scmp.lt.s32.totalorder %s761_s5, %s761_s5 }
  0x23   : > { %p764_p10 = pnand %p762_p9, %p750_p13  ;;  %p771_p8 = por %p770_p4, %p769_p1 }
  0x25   : > { %p765_p6 = pneg %p764_p10 }
  0x27   : > { %p772_p2 = pnand %p771_p8, %p765_p6 }
  0x29   : > { %775 = shalt.err (!%p772_p2)
}
  0x2a   : > { %s895_s6 = smov 128   ;;  %s896_s7 = smov 8  }
  0x2b   : > { %680 = dma.hbm_to_vmem [thread:$0]  (!%p981_p11), %s1157_s1, 4096, %s144_s23, [#allocation7], %s895_s6, %s895_s6, %s896_s7  }
  0x2c   : > { %p40_p1 = scmp.ge.s32.totalorder %s38_s25, 2  ;;  %s47_s16 = sadd.s32 1, %s880_s11 }
  0x2d   : > { %p54_p2 = scmp.ne.s32.totalorder %s880_s11, %s876_s10  ;;  %p55_p4 = scmp.eq.s32.totalorder %s892_s14, 0 }
  0x2e   : > { %s1184_s25 = smov (%p40_p1, %s38_s25), 0  ;;  %p1170_p8 = scmp.ne.s32.totalorder %s1164_s18, 0 }
  0x2f   : > { %p1008_p6 = por %p55_p4, %p54_p2  ;;  %s42_s24 = ssub.s32 %s888_s13, %s1184_s25 }
  0x30   : > { %p1014_p10 = por %p1170_p8, %p54_p2  ;;  %p690_p12 = scmp.lt.s32.totalorder %s892_s14, 2 }
  0x31   : > { %p45_p11 = scmp.eq.s32.totalorder %s42_s24, 0  ;;  %s157_s23 = sand.u32 1, %s880_s11  }
  0x32   : > { %s549_s27 = sshll.u32 %s157_s23, 7  ;;  %s563_s29 = sshll.u32 %s888_s13, 11 }
  0x33   : > { %s1023_s28 = scalar_select %p45_p11, %s880_s11, %s47_s16  }
  0x34   : > { %s1029_s4 = scalar_lea.hbm %s1156_s0, %s563_s29  ;;  %s161_s18 = scalar_lea.vmem [#allocation3], %s549_s27 }
  0x35   : > { %s171_s5 = sshll.u32 %s161_s18, 4  ;;  %p1035_p13 = pnand %p690_p12, %p1008_p6  ;;  %s1031_s5 = int_to_ptr.vmem [resolvable:$true] %s171_s5 }
  0x36   : > { %s1039_s7 = scalar_lea.sflag [#allocation4], %s157_s23  ;;  %s776_s8 = scalar_lea.hbm %s1029_s4, 2048 }
  0x37   : > { %p777_p0 = scmp.ne.s32.totalorder %s1029_s4, %s776_s8  ;;  %p778_p3 = pneg %p1035_p13 }
  0x38   : > { %s781_s22 = scalar_lea.hbm %s1156_s0, 4096  ;;  %p782_p9 = scmp.lt.u32.totalorder %s1029_s4, %s1156_s0 }
  0x39   : > { %p779_p5 = pnand %p778_p3, %p777_p0  ;;  %p783_p1 = scmp.lt.u32.totalorder %s781_s22, %s776_s8 }
  0x3a   : > { %p785_p4 = scmp.lt.u32.totalorder %s776_s8, %s1029_s4 }
  0x3b   : > { %p780_p7 = pneg %p779_p5  ;;  %p784_p2 = por %p783_p1, %p782_p9 }
  0x3d   : > { %p786_p6 = por %p785_p4, %p784_p2 }
  0x3f   : > { %p787_p8 = pnand %p786_p6, %p780_p7 }
  0x41   : > { %790 = shalt.err (!%p787_p8)
}
  0x42   : > { %s791_s23 = scalar_lea.vmem %s1031_s5, 2048  ;;  %s897_s29 = smov [#allocation3]  }
  0x43   : > { %p792_p12 = scmp.ne.s32.totalorder %s1031_s5, %s791_s23  ;;  %s796_s30 = sshll.u32 %s897_s29, 4  ;;  %s797_s30 = int_to_ptr.vmem [resolvable:$false] %s796_s30 }
  0x44   : > { %s798_s3 = scalar_lea.vmem %s797_s30, 4096  ;;  %p799_p5 = scmp.lt.s32.totalorder %s1031_s5, %s797_s30 }
  0x45   : > { %p794_p11 = pnand %p792_p12, %p778_p3  ;;  %p800_p9 = scmp.lt.s32.totalorder %s798_s3, %s791_s23 }
  0x47   : > { %p795_p0 = pneg %p794_p11  ;;  %p801_p1 = por %p800_p9, %p799_p5 }
  0x49   : > { %p802_p2 = pnand %p801_p1, %p795_p0 }
  0x4b   : > { %805 = shalt.err (!%p802_p2)
}
  0x4c   : > { %s898_s18 = smov 256   ;;  %s899_s8 = smov 16  }
  0x4d   : > { %684 = dma.hbm_to_vmem [thread:$0]  (!%p1035_p13), %s1029_s4, 2048, %s1031_s5, %s1039_s7, %s898_s18, %s898_s18, %s899_s8  }
  0x4e   : > { %p1173_p3 = scmp.ne.s32.totalorder %s1167_s21, 0 }
  0x4f   : > { %s1070_s15 = sand.u32 (!%p1173_p3), 1, %s876_s10   ;;  %p1174_p7 = scmp.ne.s32.totalorder (!%p1173_p3), %s1165_s19, 0 }
  0x50   : > { %183 = sbr.rel (%p1173_p3) target bundleno = 368 (0x170), region = 28  ;;  %s554_s16 = sshll.u32 (!%p1173_p3), %s1070_s15, 7 }
  0x51   : > { %s186_s22 = scalar_lea.sflag (!%p1173_p3), [#allocation4], %s1070_s15  ;;  %s1074_s24 = scalar_lea.vmem (!%p1173_p3), [#allocation3], %s554_s16 }
  0x57   : > { %859 = dma.done.wait (%p1174_p7), %s186_s22, 2048  }
  0x58   : > { %861 = vsyncadd (%p1174_p7), %s186_s22, 4294965248  ;;  %p1175_p13 = scmp.ne.s32.totalorder %s1163_s17, 0 }
  0x5a   : > { %863 = dma.done.wait (%p1175_p13), [#allocation7], 4096  }
  0x5b   : > { %865 = vsyncadd (%p1175_p13), [#allocation7], 4294963200  ;;  %v270_v0 = vld [vmem:[#allocation6 + $0x80] sm:$0xff]  ;;  %v271_v1 = vld [vmem:[#allocation6 + $0x88] sm:$0xff]  ;;  %s556_s17 = sshll.u32 %s1070_s15, 6  ;;  %s564_s4 = sshll.u32 %s884_s12, 10 }
  0x5c   : > { %v254_v2 = vld [vmem:[#allocation6] sm:$0xff]  ;;  %v621_v3 = vpack.c.bf16 %v271_v1, %v270_v0  ;;  %v255_v4 = vld [vmem:[#allocation6 + $0x8] sm:$0xff]  ;;  %v272_v5 = vld [vmem:[#allocation6 + $0x90] sm:$0xff]  ;;  %s213_s19 = scalar_lea.vmem [#allocation8], %s556_s17  ;;  %s1107_s7 = scalar_lea.hbm %s1158_s2, %s564_s4 }
  0x5d   : > { %v273_v6 = vld [vmem:[#allocation6 + $0x98] sm:$0xff]  ;;  %v623_v7 = vpack.c.bf16 %v255_v4, %v254_v2  ;;  %v256_v9 = vld [vmem:[#allocation6 + $0x10] sm:$0xff]  ;;  %v274_v11 = vld [vmem:[#allocation6 + $0xa0] sm:$0xff]  ;;  %s441_s21 = sshll.u32 %s213_s19, 4  ;;  %s427_s12 = scalar_lea.sflag [#allocation5], %s1070_s15  ;;  %s1102_s21 = int_to_ptr.vmem [resolvable:$true] %s441_s21 }
  0x5e   : > { %v625_v8 = vpack.c.bf16 %v273_v6, %v272_v5  ;;  %v257_v10 = vld [vmem:[#allocation6 + $0x18] sm:$0xff]  ;;  %622 = vmatprep.subr.bf16.mxu0 %v621_v3  ;;  %653 = vmatprep.subr.bf16.mxu1 %v621_v3  ;;  %v275_v12 = vld [vmem:[#allocation6 + $0xa8] sm:$0xff]  ;;  %v258_v15 = vld [vmem:[#allocation6 + $0x20] sm:$0xff]  ;;  %s806_s27 = scalar_lea.vmem %s1102_s21, 1024  ;;  %s900_s23 = smov [#allocation8]  }
  0x5f   : > { %624 = vmatpush3.bf16.msra.mxu0 %v623_v7  ;;  %661 = vmatpush3.bf16.msra.mxu1 %v623_v7  ;;  %v627_v13 = vpack.c.bf16 %v257_v10, %v256_v9  ;;  %v629_v14 = vpack.c.bf16 %v275_v12, %v274_v11  ;;  %v259_v16 = vld [vmem:[#allocation6 + $0x28] sm:$0xff]  ;;  %v276_v17 = vld [vmem:[#allocation6 + $0xb0] sm:$0xff]  ;;  %v277_v18 = vld [vmem:[#allocation6 + $0xb8] sm:$0xff]  ;;  %p807_p4 = scmp.ne.s32.totalorder %s1102_s21, %s806_s27  ;;  %s810_s29 = sshll.u32 %s900_s23, 4  ;;  %s811_s29 = int_to_ptr.vmem [resolvable:$false] %s810_s29 }
  0x60   : > { %626 = vmatprep.subr.bf16.mxu0 %v625_v8  ;;  %654 = vmatprep.subr.bf16.mxu1 %v625_v8  ;;  %v631_v19 = vpack.c.bf16 %v259_v16, %v258_v15  ;;  %v633_v20 = vpack.c.bf16 %v277_v18, %v276_v17  ;;  %v260_v21 = vld [vmem:[#allocation6 + $0x30] sm:$0xff]  ;;  %v261_v22 = vld [vmem:[#allocation6 + $0x38] sm:$0xff]  ;;  %v278_v23 = vld [vmem:[#allocation6 + $0xc0] sm:$0xff]  ;;  %s812_s30 = scalar_lea.vmem %s811_s29, 2048  ;;  %p813_p12 = scmp.lt.s32.totalorder %s1102_s21, %s811_s29 }
  0x61   : > { %v279_v24 = vld [vmem:[#allocation6 + $0xc8] sm:$0xff]  ;;  %v635_v27 = vpack.c.bf16 %v261_v22, %v260_v21  ;;  %v262_v29 = vld [vmem:[#allocation6 + $0x40] sm:$0xff]  ;;  %v280_v31 = vld [vmem:[#allocation6 + $0xd0] sm:$0xff]  ;;  %p808_p6 = pnand %p807_p4, %p1014_p10  ;;  %p814_p11 = scmp.lt.s32.totalorder %s812_s30, %s806_s27 }
  0x62   : > { %v239_v25 = vld [vmem:[%s1074_s24 + $0x8] sm:$0xff]  ;;  %v637_v28 = vpack.c.bf16 %v279_v24, %v278_v23  ;;  %v281_v32 = vld [vmem:[#allocation6 + $0xd8] sm:$0xff]  ;;  %v264_v35 = vld [vmem:[#allocation6 + $0x50] sm:$0xff] }
  0x63   : > { %628 = vmatpush3.bf16.msra.mxu0 %v627_v13  ;;  %662 = vmatpush3.bf16.msra.mxu1 %v627_v13  ;;  %v247_v26 = vld [vmem:[%s1074_s24 + $0x48] sm:$0xff]  ;;  %v641_v34 = vpack.c.bf16 %v281_v32, %v280_v31  ;;  %v265_v36 = vld [vmem:[#allocation6 + $0x58] sm:$0xff]  ;;  %v282_v37 = vld [vmem:[#allocation6 + $0xe0] sm:$0xff]  ;;  %p809_p8 = pneg %p808_p6  ;;  %p815_p0 = por %p814_p11, %p813_p12 }
  0x64   : > { %630 = vmatprep.subr.bf16.mxu0 %v629_v14  ;;  %655 = vmatprep.subr.bf16.mxu1 %v629_v14  ;;  %v263_v30 = vld [vmem:[#allocation6 + $0x48] sm:$0xff]  ;;  %v643_v39 = vpack.c.bf16 %v265_v36, %v264_v35  ;;  %v266_v41 = vld [vmem:[#allocation6 + $0x60] sm:$0xff]  ;;  %v284_v43 = vld [vmem:[#allocation6 + $0xf0] sm:$0xff] }
  0x65   : > { %350 = vmatprep.mubr.f32.mxu0 %v239_v25  ;;  %370 = vmatprep.mubr.f32.mxu1 %v247_v26  ;;  %v639_v33 = vpack.c.bf16 %v263_v30, %v262_v29  ;;  %v283_v38 = vld [vmem:[#allocation6 + $0xe8] sm:$0xff]  ;;  %v285_v44 = vld [vmem:[#allocation6 + $0xf8] sm:$0xff]  ;;  %v268_v47 = vld [vmem:[#allocation6 + $0x70] sm:$0xff]  ;;  %p816_p5 = pnand %p815_p0, %p809_p8 }
  0x66   : > { %v645_v40 = vpack.c.bf16 %v283_v38, %v282_v37  ;;  %v267_v42 = vld [vmem:[#allocation6 + $0x68] sm:$0xff]  ;;  %v649_v46 = vpack.c.bf16 %v285_v44, %v284_v43  ;;  %v269_v48 = vld [vmem:[#allocation6 + $0x78] sm:$0xff]  ;;  %v238_v50 = vld [vmem:[%s1074_s24] sm:$0xff] }
  0x67   : > { %632 = vmatpush3.bf16.msra.mxu0 %v631_v19  ;;  %663 = vmatpush3.bf16.msra.mxu1 %v631_v19  ;;  %v647_v45 = vpack.c.bf16 %v267_v42, %v266_v41  ;;  %v651_v49 = vpack.c.bf16 %v269_v48, %v268_v47  ;;  %v246_v51 = vld [vmem:[%s1074_s24 + $0x40] sm:$0xff]  ;;  %v241_v52 = vld [vmem:[%s1074_s24 + $0x18] sm:$0xff]  ;;  %v240_v54 = vld [vmem:[%s1074_s24 + $0x10] sm:$0xff] }
  0x68   : > { %634 = vmatprep.subr.bf16.mxu0 %v633_v20  ;;  %656 = vmatprep.subr.bf16.mxu1 %v633_v20  ;;  %v249_v53 = vld [vmem:[%s1074_s24 + $0x58] sm:$0xff]  ;;  %v248_v55 = vld [vmem:[%s1074_s24 + $0x50] sm:$0xff]  ;;  %v243_v56 = vld [vmem:[%s1074_s24 + $0x28] sm:$0xff] }
  0x69   : > { %v251_v57 = vld [vmem:[%s1074_s24 + $0x68] sm:$0xff]  ;;  %v242_v58 = vld [vmem:[%s1074_s24 + $0x20] sm:$0xff]  ;;  %v245_v60 = vld [vmem:[%s1074_s24 + $0x38] sm:$0xff] }
  0x6a   : > { %v250_v59 = vld [vmem:[%s1074_s24 + $0x60] sm:$0xff]  ;;  %v253_v61 = vld [vmem:[%s1074_s24 + $0x78] sm:$0xff]  ;;  %v244_v62 = vld [vmem:[%s1074_s24 + $0x30] sm:$0xff] }
  0x6b   : > { %636 = vmatpush3.bf16.msra.mxu0 %v635_v27  ;;  %664 = vmatpush3.bf16.msra.mxu1 %v635_v27  ;;  %v252_v63 = vld [vmem:[%s1074_s24 + $0x70] sm:$0xff] }
  0x6c   : > { %638 = vmatprep.subr.bf16.mxu0 %v637_v28  ;;  %657 = vmatprep.subr.bf16.mxu1 %v637_v28 }
  0x6f   : > { %640 = vmatpush3.bf16.msra.mxu0 %v639_v33  ;;  %665 = vmatpush3.bf16.msra.mxu1 %v639_v33 }
  0x70   : > { %642 = vmatprep.subr.bf16.mxu0 %v641_v34  ;;  %658 = vmatprep.subr.bf16.mxu1 %v641_v34 }
  0x73   : > { %644 = vmatpush3.bf16.msra.mxu0 %v643_v39  ;;  %666 = vmatpush3.bf16.msra.mxu1 %v643_v39 }
  0x74   : > { %646 = vmatprep.subr.bf16.mxu0 %v645_v40  ;;  %659 = vmatprep.subr.bf16.mxu1 %v645_v40 }
  0x77   : > { %648 = vmatpush3.bf16.msra.mxu0 %v647_v45  ;;  %667 = vmatpush3.bf16.msra.mxu1 %v647_v45 }
  0x78   : > { %650 = vmatprep.subr.bf16.mxu0 %v649_v46  ;;  %660 = vmatprep.subr.bf16.mxu1 %v649_v46 }
  0x7b   : > { %652 = vmatpush3.bf16.msra.mxu0 %v651_v49  ;;  %668 = vmatpush3.bf16.msra.mxu1 %v651_v49 }
  0x7e   : > { %351 = vmatmul.mubr.f32.vlgmr.msra.gmra.mrb[0].mxu0 %v238_v50  ;;  %371 = vmatmul.mubr.f32.vlgmr.msra.gmra.mrb[0].mxu1 %v246_v51 }
  0x7f   : > { %355 = vmatprep.mubr.f32.mxu0 %v241_v52  ;;  %375 = vmatprep.mubr.f32.mxu1 %v249_v53 }
  0x82   : > { %356 = vmatmul.mubr.f32.gmra.mrb[2].mxu0 %v240_v54  ;;  %376 = vmatmul.mubr.f32.gmra.mrb[2].mxu1 %v248_v55 }
  0x83   : > { %360 = vmatprep.mubr.f32.mxu0 %v243_v56  ;;  %380 = vmatprep.mubr.f32.mxu1 %v251_v57 }
  0x86   : > { %361 = vmatmul.mubr.f32.gmra.mrb[4].mxu0 %v242_v58  ;;  %381 = vmatmul.mubr.f32.gmra.mrb[4].mxu1 %v250_v59 }
  0x87   : > { %365 = vmatprep.mubr.f32.mxu0 %v245_v60  ;;  %385 = vmatprep.mubr.f32.mxu1 %v253_v61 }
  0x8a   : > { %366 = vmatmul.mubr.f32.gmra.mrb[6].mxu0 %v244_v62  ;;  %386 = vmatmul.mubr.f32.gmra.mrb[6].mxu1 %v252_v63 }
 0x151   : > { %v597_v0 = vpop.f32.mrb[0].mxu0  ;;  %v609_v1 = vpop.f32.mrb[0].mxu1 }
 0x152   : > { %v598_v2 = vpop.f32.mrb[1].mxu0  ;;  %v610_v3 = vpop.f32.mrb[1].mxu1 }
 0x153   : > { %v599_v4 = vadd.f32 %v598_v2, %v597_v0  ;;  %v611_v5 = vadd.f32 %v610_v3, %v609_v1 }
 0x155   : > { %418 = vst [vmem:[%s213_s19] sm:$0xff] %v599_v4  ;;  %422 = vst [vmem:[%s213_s19 + $0x20] sm:$0xff] %v611_v5  ;;  %v600_v6 = vpop.f32.mrb[2].mxu0  ;;  %v612_v7 = vpop.f32.mrb[2].mxu1 }
 0x156   : > { %v601_v8 = vpop.f32.mrb[3].mxu0  ;;  %v613_v9 = vpop.f32.mrb[3].mxu1 }
 0x157   : > { %v602_v10 = vadd.f32 %v601_v8, %v600_v6  ;;  %v614_v11 = vadd.f32 %v613_v9, %v612_v7 }
 0x159   : > { %419 = vst [vmem:[%s213_s19 + $0x8] sm:$0xff] %v602_v10  ;;  %423 = vst [vmem:[%s213_s19 + $0x28] sm:$0xff] %v614_v11  ;;  %v603_v12 = vpop.f32.mrb[4].mxu0  ;;  %v615_v13 = vpop.f32.mrb[4].mxu1 }
 0x15a   : > { %v604_v14 = vpop.f32.mrb[5].mxu0  ;;  %v616_v15 = vpop.f32.mrb[5].mxu1 }
 0x15b   : > { %v605_v16 = vadd.f32 %v604_v14, %v603_v12  ;;  %v617_v17 = vadd.f32 %v616_v15, %v615_v13 }
 0x15d   : > { %420 = vst [vmem:[%s213_s19 + $0x10] sm:$0xff] %v605_v16  ;;  %424 = vst [vmem:[%s213_s19 + $0x30] sm:$0xff] %v617_v17  ;;  %v606_v18 = vpop.f32.mrb[6].mxu0  ;;  %v618_v19 = vpop.f32.mrb[6].mxu1 }
 0x15e   : > { %v607_v20 = vpop.f32.mrb[7].mxu0  ;;  %v619_v21 = vpop.f32.mrb[7].mxu1 }
 0x15f   : > { %v608_v22 = vadd.f32 %v607_v20, %v606_v18  ;;  %v620_v23 = vadd.f32 %v619_v21, %v618_v19 }
 0x161   : > { %421 = vst [vmem:[%s213_s19 + $0x18] sm:$0xff] %v608_v22  ;;  %425 = vst [vmem:[%s213_s19 + $0x38] sm:$0xff] %v620_v23 }
 0x162   : > { %819 = shalt.err (!%p816_p5)
}
 0x163   : > { %s820_s3 = scalar_lea.hbm %s1107_s7, 1024  ;;  %s824_s16 = scalar_lea.hbm %s1158_s2, 2048 }
 0x164   : > { %p821_p9 = scmp.ne.s32.totalorder %s1107_s7, %s820_s3  ;;  %p825_p3 = scmp.lt.u32.totalorder %s1107_s7, %s1158_s2 }
 0x165   : > { %p826_p7 = scmp.lt.u32.totalorder %s824_s16, %s820_s3  ;;  %p828_p4 = scmp.lt.u32.totalorder %s820_s3, %s1107_s7 }
 0x166   : > { %p822_p1 = pnand %p821_p9, %p1014_p10 }
 0x167   : > { %p827_p13 = por %p826_p7, %p825_p3 }
 0x168   : > { %p823_p2 = pneg %p822_p1 }
 0x169   : > { %p829_p6 = por %p828_p4, %p827_p13 }
 0x16b   : > { %p830_p8 = pnand %p829_p6, %p823_p2 }
 0x16d   : > { %833 = shalt.err (!%p830_p8)
}
 0x16e   : > { %s901_s17 = smov 128   ;;  %s902_s19 = smov 8  }
 0x16f   : > { %675 = dma.vmem_to_hbm [thread:$0]  (%p1014_p10), %s1102_s21, 1024, %s1107_s7, %s427_s12, %s901_s17, %s901_s17, %s902_s19  }
 0x170 PF: > { %s456_s4 = sand.u32 1, %s872_s9   ;;  %p1176_p12 = scmp.ne.s32.totalorder %s1166_s20, 0 }
 0x171   : > { %p1177_p11 = scmp.ge.s32.totalorder %s892_s14, 2  ;;  %s457_s5 = scalar_lea.sflag [#allocation5], %s456_s4 }
 0x173   : > { %p686_p0 = pnand %p1177_p11, %p1176_p12 }
 0x175   : > { %867 = dma.done.wait (!%p686_p0), %s457_s5, 1024  }
 0x176   : > { %869 = vsyncadd (!%p686_p0), %s457_s5, 4294966272  ;;  %s19_s14 = sadd.s32 1, %s892_s14   ;;  %s1178_s9 = smov %s876_s10 }
 0x177   : > { %p16_p5 = scmp.ge.s32.totalorder %s19_s14, 4   ;;  %s1179_s10 = smov %s880_s11 }
 0x178   : > { %s1180_s11 = smov %s1023_s28  ;;  %s1181_s12 = smov %s888_s13 }
 0x179   : > { %s1182_s13 = smov %s1184_s25  ;;  %18 = sbr.rel (!%p16_p5) target bundleno = 7 (0x7), region = 86 }
 0x180   :  { %462 = vsyncpa [#allocation4], 1 }
 0x181   :  { %464 = vsyncpa [#allocation4 + $0x1], 1 }
 0x182   :  { %465 = vsyncpa [#allocation7], 1 }
 0x183   :  { %466 = vsyncpa [#allocation5], 1 }
 0x184   :  { %468 = vsyncpa [#allocation5 + $0x1], 1 }

</bundles_post_ra>
